<compile_context>
chip_gen: v6e
topology: v6e:2x2x1
jax: 0.10.0
libtpu: 0.0.40
codegen_flags: <defaults>
</compile_context>

<pallas_src>
import jax
import jax.numpy as jnp
from jax.experimental import pallas as pl
from jax.experimental.pallas import tpu as pltpu


def _make_concat_dma_kernel(n_ctx, n_suf):
    """Kernel: scatter prefix / ctx / suffix into the output via 3 async DMAs."""

    def kernel(prefix_hbm, ctx_hbm, suffix_hbm, out_hbm, sem):
        # Largest copy first so it is in flight the longest.
        cp_suf = pltpu.make_async_copy(
            suffix_hbm, out_hbm.at[:, pl.ds(1 + n_ctx, n_suf), :], sem.at[0]
        )
        cp_ctx = pltpu.make_async_copy(
            ctx_hbm, out_hbm.at[:, pl.ds(1, n_ctx), :], sem.at[1]
        )
        cp_pre = pltpu.make_async_copy(
            prefix_hbm, out_hbm.at[:, pl.ds(0, 1), :], sem.at[2]
        )
        cp_suf.start()
        cp_ctx.start()
        cp_pre.start()
        cp_suf.wait()
        cp_ctx.wait()
        cp_pre.wait()

    return kernel


def prompt_learning_forward(
    token_prefix,
    optimized_ctx,
    token_suffix,
    *,
    min_kernel_bytes=64 * 1024,
    force_kernel=False,
):
    """Concatenate [prefix, ctx, suffix] along the sequence axis (dim=1).

    Semantically identical to
        jnp.concatenate([token_prefix, optimized_ctx, token_suffix], axis=1)

    Implemented as a pure-DMA scatter kernel (inputs/output stay in HBM);
    falls back to XLA's native concat for tiny or degenerate problems.
    """
    n_cls, one, ctx_dim = token_prefix.shape
    assert one == 1, "token_prefix must have a single sequence position"
    assert optimized_ctx.shape[0] == n_cls and optimized_ctx.shape[2] == ctx_dim
    assert token_suffix.shape[0] == n_cls and token_suffix.shape[2] == ctx_dim
    assert optimized_ctx.dtype == token_prefix.dtype
    assert token_suffix.dtype == token_prefix.dtype

    n_ctx = optimized_ctx.shape[1]
    n_suf = token_suffix.shape[1]
    seq = 1 + n_ctx + n_suf
    dtype = token_prefix.dtype
    itemsize = jnp.dtype(dtype).itemsize
    total_bytes = n_cls * seq * ctx_dim * itemsize

    # Kernel path: non-degenerate ctx/suffix (no zero-size DMAs) and enough
    # data to amortize the fixed pallas_call launch overhead.
    kernel_ok = (
        n_ctx > 0
        and n_suf > 0
        and (force_kernel or total_bytes >= min_kernel_bytes)
    )
    if not kernel_ok:
        return jnp.concatenate([token_prefix, optimized_ctx, token_suffix], axis=1)

    return pl.pallas_call(
        _make_concat_dma_kernel(n_ctx, n_suf),
        out_shape=jax.ShapeDtypeStruct((n_cls, seq, ctx_dim), dtype),
        in_specs=[
            pl.BlockSpec(memory_space=pl.ANY),
            pl.BlockSpec(memory_space=pl.ANY),
            pl.BlockSpec(memory_space=pl.ANY),
        ],
        out_specs=pl.BlockSpec(memory_space=pl.ANY),
        scratch_shapes=[pltpu.SemaphoreType.DMA((3,))],
        cost_estimate=pl.CostEstimate(
            flops=0, transcendentals=0, bytes_accessed=2 * total_bytes
        ),
    )(token_prefix, optimized_ctx, token_suffix)


def prompt_ctx_scatter(prompt_buffer, optimized_ctx, *, n_prefix=1):
    """Write `optimized_ctx` into rows [n_prefix, n_prefix+n_ctx) of a
    pre-assembled [n_cls, seq, D] prompt buffer, in place via
    input_output_aliases.  Only the n_ctx learnable rows are moved through
    HBM (~seq/n_ctx less traffic than the full concat).
    """
    n_cls, seq, ctx_dim = prompt_buffer.shape
    assert optimized_ctx.shape[0] == n_cls and optimized_ctx.shape[2] == ctx_dim
    assert optimized_ctx.dtype == prompt_buffer.dtype
    n_ctx = optimized_ctx.shape[1]
    assert n_prefix + n_ctx <= seq
    itemsize = jnp.dtype(prompt_buffer.dtype).itemsize
    ctx_bytes = n_cls * n_ctx * ctx_dim * itemsize

    def kernel(buf_hbm, ctx_hbm, out_hbm, sem):
        del buf_hbm  # aliased with out_hbm; untouched rows keep their values
        cp = pltpu.make_async_copy(
            ctx_hbm, out_hbm.at[:, pl.ds(n_prefix, n_ctx), :], sem
        )
        cp.start()
        cp.wait()

    return pl.pallas_call(
        kernel,
        out_shape=jax.ShapeDtypeStruct(prompt_buffer.shape, prompt_buffer.dtype),
        in_specs=[
            pl.BlockSpec(memory_space=pl.ANY),
            pl.BlockSpec(memory_space=pl.ANY),
        ],
        out_specs=pl.BlockSpec(memory_space=pl.ANY),
        scratch_shapes=[pltpu.SemaphoreType.DMA],
        input_output_aliases={0: 0},
        cost_estimate=pl.CostEstimate(
            flops=0, transcendentals=0, bytes_accessed=2 * ctx_bytes
        ),
    )(prompt_buffer, optimized_ctx)


def _make_inputs(key, n_cls, n_ctx, seq, ctx_dim, dtype):
    n_suf = seq - 1 - n_ctx
    k_pre, k_ctx, k_suf = jax.random.split(key, 3)
    token_prefix = jax.random.normal(k_pre, (n_cls, 1, ctx_dim)).astype(dtype)
    optimized_ctx = jax.random.normal(k_ctx, (n_cls, n_ctx, ctx_dim)).astype(dtype)
    token_suffix = jax.random.normal(k_suf, (n_cls, n_suf, ctx_dim)).astype(dtype)
    return token_prefix, optimized_ctx, token_suffix


if __name__ == "__main__":
    key = jax.random.PRNGKey(0)
    k1, k2, k3, k4 = jax.random.split(key, 4)

    # --- Test 1: DMA-scatter kernel path, f32 -------------------------------
    # CLIP-like but small: 12 classes, 4 learnable ctx tokens, seq 24, D 128.
    n_cls, n_ctx, seq, ctx_dim = 12, 4, 24, 128
    pre, ctx, suf = _make_inputs(k1, n_cls, n_ctx, seq, ctx_dim, jnp.float32)
    out = jax.block_until_ready(prompt_learning_forward(pre, ctx, suf))
    ref = jnp.concatenate([pre, ctx, suf], axis=1)
    assert out.shape == (n_cls, seq, ctx_dim)
    assert out.dtype == jnp.float32
    assert jnp.array_equal(out, ref)

    # --- Test 2: DMA-scatter kernel path, bf16 (realistic CLIP dtype) -------
    pre2, ctx2, suf2 = _make_inputs(k2, 10, 16, 32, 128, jnp.bfloat16)
    out2 = jax.block_until_ready(
        prompt_learning_forward(pre2, ctx2, suf2, force_kernel=True)
    )
    ref2 = jnp.concatenate([pre2, ctx2, suf2], axis=1)
    assert out2.dtype == jnp.bfloat16
    assert jnp.array_equal(out2, ref2)

    # --- Test 3: tiny problem -> fallback path (XLA concat) -----------------
    pre3, ctx3, suf3 = _make_inputs(k3, 3, 4, 16, 128, jnp.float32)
    out3 = jax.block_until_ready(prompt_learning_forward(pre3, ctx3, suf3))
    ref3 = jnp.concatenate([pre3, ctx3, suf3], axis=1)
    assert jnp.array_equal(out3, ref3)

    # --- Test 4: in-place ctx scatter into a pre-assembled prompt buffer ----
    prompt_buf = jnp.concatenate([pre, ctx, suf], axis=1)  # assembled once
    new_ctx = jax.random.normal(k4, ctx.shape).astype(ctx.dtype)
    out4 = jax.block_until_ready(prompt_ctx_scatter(prompt_buf, new_ctx))
    ref4 = jnp.concatenate([pre, new_ctx, suf], axis=1)
    assert jnp.array_equal(out4, ref4)

    print("KERNEL_OK")
</pallas_src>

<mosaic_0001>
module attributes {stable_mosaic.version = 11 : i64} {
  func.func @kernel(%arg0: memref<12x1x128xf32, #tpu.memory_space<any>>, %arg1: memref<12x4x128xf32, #tpu.memory_space<any>>, %arg2: memref<12x19x128xf32, #tpu.memory_space<any>>, %arg3: memref<12x24x128xf32, #tpu.memory_space<any>>, %arg4: memref<3x!tpu.dma_semaphore, #tpu.memory_space<semaphore_mem>>) attributes {dimension_semantics = [], scalar_prefetch = 0 : i64, scratch_operands = 1 : i64, tpu.core_type = #tpu.core_type<tc>} {
    %c0_i32 = arith.constant 0 : i32
    %c0_i32_0 = arith.constant 0 : i32
    %c5_i32 = arith.constant 5 : i32
    %c0_i32_1 = arith.constant 0 : i32
    %0 = tpu.memref_slice %arg3[%c0_i32_0, %c5_i32, %c0_i32_1] : memref<12x24x128xf32, #tpu.memory_space<any>> -> memref<12x19x128xf32, #tpu.memory_space<any>>
    %1 = tpu.memref_slice %arg4[%c0_i32] : memref<3x!tpu.dma_semaphore, #tpu.memory_space<semaphore_mem>> -> memref<1x!tpu.dma_semaphore, #tpu.memory_space<semaphore_mem>>
    %2 = tpu.memref_squeeze %1 : memref<1x!tpu.dma_semaphore, #tpu.memory_space<semaphore_mem>> -> memref<!tpu.dma_semaphore, #tpu.memory_space<semaphore_mem>>
    tpu.enqueue_dma source(%arg2 : memref<12x19x128xf32, #tpu.memory_space<any>>) target(%0 : memref<12x19x128xf32, #tpu.memory_space<any>>) target_semaphore(%2 : memref<!tpu.dma_semaphore, #tpu.memory_space<semaphore_mem>>)
    %c1_i32 = arith.constant 1 : i32
    %c0_i32_2 = arith.constant 0 : i32
    %c1_i32_3 = arith.constant 1 : i32
    %c0_i32_4 = arith.constant 0 : i32
    %3 = tpu.memref_slice %arg3[%c0_i32_2, %c1_i32_3, %c0_i32_4] : memref<12x24x128xf32, #tpu.memory_space<any>> -> memref<12x4x128xf32, #tpu.memory_space<any>>
    %4 = tpu.memref_slice %arg4[%c1_i32] : memref<3x!tpu.dma_semaphore, #tpu.memory_space<semaphore_mem>> -> memref<1x!tpu.dma_semaphore, #tpu.memory_space<semaphore_mem>>
    %5 = tpu.memref_squeeze %4 : memref<1x!tpu.dma_semaphore, #tpu.memory_space<semaphore_mem>> -> memref<!tpu.dma_semaphore, #tpu.memory_space<semaphore_mem>>
    tpu.enqueue_dma source(%arg1 : memref<12x4x128xf32, #tpu.memory_space<any>>) target(%3 : memref<12x4x128xf32, #tpu.memory_space<any>>) target_semaphore(%5 : memref<!tpu.dma_semaphore, #tpu.memory_space<semaphore_mem>>)
    %c2_i32 = arith.constant 2 : i32
    %c0_i32_5 = arith.constant 0 : i32
    %c0_i32_6 = arith.constant 0 : i32
    %c0_i32_7 = arith.constant 0 : i32
    %6 = tpu.memref_slice %arg3[%c0_i32_5, %c0_i32_6, %c0_i32_7] : memref<12x24x128xf32, #tpu.memory_space<any>> -> memref<12x1x128xf32, #tpu.memory_space<any>>
    %7 = tpu.memref_slice %arg4[%c2_i32] : memref<3x!tpu.dma_semaphore, #tpu.memory_space<semaphore_mem>> -> memref<1x!tpu.dma_semaphore, #tpu.memory_space<semaphore_mem>>
    %8 = tpu.memref_squeeze %7 : memref<1x!tpu.dma_semaphore, #tpu.memory_space<semaphore_mem>> -> memref<!tpu.dma_semaphore, #tpu.memory_space<semaphore_mem>>
    tpu.enqueue_dma source(%arg0 : memref<12x1x128xf32, #tpu.memory_space<any>>) target(%6 : memref<12x1x128xf32, #tpu.memory_space<any>>) target_semaphore(%8 : memref<!tpu.dma_semaphore, #tpu.memory_space<semaphore_mem>>)
    %c0_i32_8 = arith.constant 0 : i32
    %c0_i32_9 = arith.constant 0 : i32
    %c5_i32_10 = arith.constant 5 : i32
    %c0_i32_11 = arith.constant 0 : i32
    %9 = tpu.memref_slice %arg3[%c0_i32_9, %c5_i32_10, %c0_i32_11] : memref<12x24x128xf32, #tpu.memory_space<any>> -> memref<12x19x128xf32, #tpu.memory_space<any>>
    %10 = tpu.memref_slice %arg4[%c0_i32_8] : memref<3x!tpu.dma_semaphore, #tpu.memory_space<semaphore_mem>> -> memref<1x!tpu.dma_semaphore, #tpu.memory_space<semaphore_mem>>
    %11 = tpu.memref_squeeze %10 : memref<1x!tpu.dma_semaphore, #tpu.memory_space<semaphore_mem>> -> memref<!tpu.dma_semaphore, #tpu.memory_space<semaphore_mem>>
    tpu.wait_dma2 semaphore(%11 : memref<!tpu.dma_semaphore, #tpu.memory_space<semaphore_mem>>) src(%arg2 : memref<12x19x128xf32, #tpu.memory_space<any>>) dst(%9 : memref<12x19x128xf32, #tpu.memory_space<any>>)
    %c1_i32_12 = arith.constant 1 : i32
    %c0_i32_13 = arith.constant 0 : i32
    %c1_i32_14 = arith.constant 1 : i32
    %c0_i32_15 = arith.constant 0 : i32
    %12 = tpu.memref_slice %arg3[%c0_i32_13, %c1_i32_14, %c0_i32_15] : memref<12x24x128xf32, #tpu.memory_space<any>> -> memref<12x4x128xf32, #tpu.memory_space<any>>
    %13 = tpu.memref_slice %arg4[%c1_i32_12] : memref<3x!tpu.dma_semaphore, #tpu.memory_space<semaphore_mem>> -> memref<1x!tpu.dma_semaphore, #tpu.memory_space<semaphore_mem>>
    %14 = tpu.memref_squeeze %13 : memref<1x!tpu.dma_semaphore, #tpu.memory_space<semaphore_mem>> -> memref<!tpu.dma_semaphore, #tpu.memory_space<semaphore_mem>>
    tpu.wait_dma2 semaphore(%14 : memref<!tpu.dma_semaphore, #tpu.memory_space<semaphore_mem>>) src(%arg1 : memref<12x4x128xf32, #tpu.memory_space<any>>) dst(%12 : memref<12x4x128xf32, #tpu.memory_space<any>>)
    %c2_i32_16 = arith.constant 2 : i32
    %c0_i32_17 = arith.constant 0 : i32
    %c0_i32_18 = arith.constant 0 : i32
    %c0_i32_19 = arith.constant 0 : i32
    %15 = tpu.memref_slice %arg3[%c0_i32_17, %c0_i32_18, %c0_i32_19] : memref<12x24x128xf32, #tpu.memory_space<any>> -> memref<12x1x128xf32, #tpu.memory_space<any>>
    %16 = tpu.memref_slice %arg4[%c2_i32_16] : memref<3x!tpu.dma_semaphore, #tpu.memory_space<semaphore_mem>> -> memref<1x!tpu.dma_semaphore, #tpu.memory_space<semaphore_mem>>
    %17 = tpu.memref_squeeze %16 : memref<1x!tpu.dma_semaphore, #tpu.memory_space<semaphore_mem>> -> memref<!tpu.dma_semaphore, #tpu.memory_space<semaphore_mem>>
    tpu.wait_dma2 semaphore(%17 : memref<!tpu.dma_semaphore, #tpu.memory_space<semaphore_mem>>) src(%arg0 : memref<12x1x128xf32, #tpu.memory_space<any>>) dst(%15 : memref<12x1x128xf32, #tpu.memory_space<any>>)
    return
  }
}

</mosaic_0001>

<bundles_post_ra>
// kernel: tpu_custom_call.1
= control target key start
LH: loop header
LB: loop body
LE: loop exit
PB: predicated region body
PF: predicated region fallthrough
CT: control target
= control target key end

     0   :  { %s103_s15 = smov 384   ;;  %s104_s16 = smov 19   ;;  %s152_s0 = inlined_call_operand.hbm [shape: f32[12,1,128], index: 0, kind: input, shape index: {}]   ;;  %s153_s1 = inlined_call_operand.hbm [shape: f32[12,4,128], index: 1, kind: input, shape index: {}]   ;;  %s154_s2 = inlined_call_operand.hbm [shape: f32[12,19,128], index: 2, kind: input, shape index: {}]   ;;  %s155_s3 = inlined_call_operand.hbm [shape: f32[12,24,128], index: 3, kind: output, shape index: {}]  }
   0x1   :  { %s8_s14 = scalar_lea.hbm %s155_s3, 80  ;;  %15 = sst [smem:[#allocation4]] %s103_s15 }
   0x2   :  { %17 = sst [smem:[#allocation4 + $0x1]] %s103_s15  ;;  %s105_s17 = smov [#allocation2]  }
   0x3   :  { %19 = sst [smem:[#allocation4 + $0x2]] %s104_s16  ;;  %s106_s18 = smov 131072  }
   0x4   :  { %s107_s19 = smov 0   ;;  %s108_s22 = smov 64  }
   0x5   :  { %21 = dma.general %s154_s2, 3648, %s8_s14, %s105_s17, %s106_s18, [#allocation4], %s107_s19, 0  }
   0x6   :  { %30 = sst [smem:[#allocation6]] %s108_s22  ;;  %s22_s25 = scalar_lea.hbm %s155_s3, 16 }
   0x7   :  { %32 = sst [smem:[#allocation6 + $0x1]] %s103_s15  ;;  %s109_s26 = smov 4  }
   0x8   :  { %34 = sst [smem:[#allocation6 + $0x2]] %s109_s26  ;;  %s110_s27 = smov [#allocation2 + $0x1]  }
   0x9   :  { %36 = dma.general %s153_s1, 768, %s22_s25, %s110_s27, %s106_s18, [#allocation6], %s107_s19, 0  }
   0xa   :  { %46 = sst [smem:[#allocation8 + $0x1]] %s103_s15  ;;  %s111_s30 = smov 16  }
   0xb   :  { %44 = sst [smem:[#allocation8]] %s111_s30  ;;  %s112_s4 = smov 1  }
   0xc   :  { %48 = sst [smem:[#allocation8 + $0x2]] %s112_s4  ;;  %s113_s2 = smov [#allocation2 + $0x2]  }
   0xd   :  { %50 = dma.general %s152_s0, 192, %s155_s3, %s113_s2, %s106_s18, [#allocation8], %s107_s19, 0  }
   0xe   :  { %97 = dma.done.wait [#allocation2], 3648 }
   0xf   :  { %98 = vsyncadd [#allocation2], 4294963648 }
  0x10   :  { %99 = dma.done.wait [#allocation2 + $0x1], 768 }
  0x11   :  { %100 = vsyncadd [#allocation2 + $0x1], 4294966528 }
  0x12   :  { %101 = dma.done.wait [#allocation2 + $0x2], 192 }
  0x13   :  { %102 = vsyncadd [#allocation2 + $0x2], 4294967104 }
  0x14   :  { %63 = vsyncmov [#allocation2] }
  0x17   :  { %s64_s1 = vpop.sfrf %63 }
  0x18   :  { %p83_p0 = scmp.ne.s32.totalorder %s64_s1, 0 }
  0x1a   :  { %68 = shalt.err (%p83_p0)  }
  0x1b   :  { %70 = vsyncmov [#allocation2 + $0x1] }
  0x1e   :  { %s71_s9 = vpop.sfrf %70 }
  0x1f   :  { %p84_p1 = scmp.ne.s32.totalorder %s71_s9, 0 }
  0x21   :  { %75 = shalt.err (%p84_p1)  }
  0x22   :  { %77 = vsyncmov [#allocation2 + $0x2] }
  0x25   :  { %s78_s10 = vpop.sfrf %77 }
  0x26   :  { %p85_p2 = scmp.ne.s32.totalorder %s78_s10, 0 }
  0x28   :  { %82 = shalt.err (%p85_p2)  }

</bundles_post_ra>
